<compile_context>
chip_gen: v7x
topology: tpu7x:2x2x1
jax: 0.10.0
libtpu: 0.0.40
codegen_flags: <defaults>
</compile_context>

<pallas_src>
import jax
import jax.numpy as jnp
from jax.experimental import pallas as pl
from jax.experimental.pallas import tpu as pltpu


def _mtl_kernel(logits_ref, labels_ref, logvars_ref, out_ref):
    # logits_ref: (T, N, C) VMEM, labels_ref: (T, N, 1) int32 VMEM,
    # logvars_ref: (T,) f32 SMEM, out_ref: (1, 1) f32 SMEM.
    logits = logits_ref[...].astype(jnp.float32)              # (T, N, C)
    labels = labels_ref[...]                                   # (T, N, 1) int32
    t_num, n, c = logits.shape

    # "Gather" the label logit via iota compare + select.
    # TODO(synk): PyTorch CrossEntropyLoss ignore_index=-100 handling is not
    # implemented; labels are assumed to be valid class indices in [0, C).
    class_ids = jax.lax.broadcasted_iota(jnp.int32, (t_num, n, c), 2)
    correct = jnp.sum(jnp.where(class_ids == labels, logits, 0.0),
                      axis=-1, keepdims=True)                  # (T, N, 1)

    # Numerically-stable log-sum-exp over the class (lane) axis, all tasks at once.
    m = jnp.max(logits, axis=-1, keepdims=True)                # (T, N, 1)
    lse = m + jnp.log(jnp.sum(jnp.exp(logits - m), axis=-1, keepdims=True))
    per_row = lse - correct                                    # (T, N, 1): -log p(label)

    # Combine the T per-task means with the uncertainty weights (static unroll, T small).
    inv_n = jnp.float32(1.0 / n)
    total = jnp.float32(0.0)
    for t in range(t_num):
        ce_t = jnp.sum(per_row[t]) * inv_n                     # reduction='mean'
        lv = logvars_ref[t]                                    # SMEM scalar read
        total = total + jnp.exp(-lv) * ce_t + lv
    out_ref[0, 0] = total                                      # single write, no RMW


def multitask_loss(logits_stacked, labels_stacked, log_vars):
    """logits_stacked: (T, N, C) float; labels_stacked: (T, N) int; log_vars: (T,) float."""
    T, N, C = logits_stacked.shape
    labels3 = labels_stacked.reshape(T, N, 1).astype(jnp.int32)
    log_vars = log_vars.astype(jnp.float32)

    out = pl.pallas_call(
        _mtl_kernel,
        out_shape=jax.ShapeDtypeStruct((1, 1), jnp.float32),
        in_specs=[
            pl.BlockSpec(memory_space=pltpu.MemorySpace.VMEM),   # logits: one whole block
            pl.BlockSpec(memory_space=pltpu.MemorySpace.VMEM),   # labels: one whole block
            pl.BlockSpec(memory_space=pltpu.MemorySpace.SMEM),   # log_vars: scalar path
        ],
        out_specs=pl.BlockSpec(memory_space=pltpu.MemorySpace.SMEM),
    )(logits_stacked, labels3, log_vars)
    return out[0, 0]


def _reference(logits_stacked, labels_stacked, log_vars):
    """Pure-JAX reference matching PyTorch CrossEntropyLoss(mean) + uncertainty weighting."""
    total = 0.0
    T = logits_stacked.shape[0]
    for t in range(T):
        x = logits_stacked[t].astype(jnp.float32)
        y = labels_stacked[t]
        logp = jax.nn.log_softmax(x, axis=-1)
        ce = -jnp.mean(jnp.take_along_axis(logp, y[:, None], axis=-1))
        total = total + jnp.exp(-log_vars[t]) * ce + log_vars[t]
    return total


if __name__ == "__main__":
    # Synthetic setup: 2 sequence-classification tasks, batch N=8, C=32 classes each.
    # (Toy shapes: lane utilization is 32/128; at real sizes keep C a multiple of 128.)
    T, N, C = 2, 8, 32

    key = jax.random.PRNGKey(0)
    k_logits, k_labels = jax.random.split(key)
    logits = jax.random.normal(k_logits, (T, N, C), dtype=jnp.float32)
    labels = jax.random.randint(k_labels, (T, N), 0, C, dtype=jnp.int32)

    # Module parameter: nn.Parameter(torch.zeros(task_num)) -> zeros at init.
    log_vars0 = jnp.zeros((T,), dtype=jnp.float32)
    out0 = jax.block_until_ready(multitask_loss(logits, labels, log_vars0))
    ref0 = _reference(logits, labels, log_vars0)
    assert jnp.allclose(out0, ref0, rtol=1e-5, atol=1e-5), (out0, ref0)

    # Also exercise non-trivial uncertainty weights (as after some training steps).
    log_vars1 = jnp.array([0.3, -0.7], dtype=jnp.float32)
    out1 = jax.block_until_ready(multitask_loss(logits, labels, log_vars1))
    ref1 = _reference(logits, labels, log_vars1)
    assert jnp.allclose(out1, ref1, rtol=1e-5, atol=1e-5), (out1, ref1)

    print("KERNEL_OK")
</pallas_src>

<mosaic_0001>
module attributes {stable_mosaic.version = 11 : i64} {
  func.func @_mtl_kernel(%arg0: memref<2x8x32xf32, #tpu.memory_space<vmem>>, %arg1: memref<2x8x1xi32, #tpu.memory_space<vmem>>, %arg2: memref<2xf32, #tpu.memory_space<smem>>, %arg3: memref<1x1xf32, #tpu.memory_space<smem>>) attributes {dimension_semantics = [], scalar_prefetch = 0 : i64, scratch_operands = 0 : i64, tpu.core_type = #tpu.core_type<tc>} {
    %c0 = arith.constant 0 : index
    %c0_0 = arith.constant 0 : index
    %c0_1 = arith.constant 0 : index
    %0 = vector.load %arg0[%c0, %c0_0, %c0_1] : memref<2x8x32xf32, #tpu.memory_space<vmem>>, vector<2x8x32xf32>
    %c0_2 = arith.constant 0 : index
    %c0_3 = arith.constant 0 : index
    %c0_4 = arith.constant 0 : index
    %1 = vector.load %arg1[%c0_2, %c0_3, %c0_4] : memref<2x8x1xi32, #tpu.memory_space<vmem>>, vector<2x8x1xi32>
    %2 = tpu.iota {dimensions = array<i32: 2>} : vector<2x8x32xi32>
    %3 = vector.broadcast %1 : vector<2x8x1xi32> to vector<2x8x32xi32>
    %4 = arith.cmpi eq, %2, %3 : vector<2x8x32xi32>
    %cst = arith.constant 0.000000e+00 : f32
    %5 = vector.broadcast %cst : f32 to vector<2x8x32xf32>
    %6 = arith.select %4, %0, %5 : vector<2x8x32xi1>, vector<2x8x32xf32>
    %cst_5 = arith.constant dense<0.000000e+00> : vector<2x8xf32>
    %7 = vector.multi_reduction <add>, %6, %cst_5 [2] : vector<2x8x32xf32> to vector<2x8xf32>
    %8 = vector.shape_cast %7 : vector<2x8xf32> to vector<2x8x1xf32>
    %cst_6 = arith.constant dense<0xFF800000> : vector<2x8xf32>
    %9 = vector.multi_reduction <maximumf>, %0, %cst_6 [2] : vector<2x8x32xf32> to vector<2x8xf32>
    %10 = vector.shape_cast %9 : vector<2x8xf32> to vector<2x8x1xf32>
    %11 = vector.broadcast %10 : vector<2x8x1xf32> to vector<2x8x32xf32>
    %12 = arith.subf %0, %11 : vector<2x8x32xf32>
    %13 = math.exp %12 : vector<2x8x32xf32>
    %cst_7 = arith.constant dense<0.000000e+00> : vector<2x8xf32>
    %14 = vector.multi_reduction <add>, %13, %cst_7 [2] : vector<2x8x32xf32> to vector<2x8xf32>
    %15 = vector.shape_cast %14 : vector<2x8xf32> to vector<2x8x1xf32>
    %16 = math.log %15 : vector<2x8x1xf32>
    %17 = arith.addf %10, %16 : vector<2x8x1xf32>
    %18 = arith.subf %17, %8 : vector<2x8x1xf32>
    %19 = vector.extract_strided_slice %18 {offsets = [0, 0, 0], sizes = [1, 8, 1], strides = [1, 1, 1]} : vector<2x8x1xf32> to vector<1x8x1xf32>
    %20 = vector.shape_cast %19 : vector<1x8x1xf32> to vector<8x1xf32>
    %21 = vector.shape_cast %20 : vector<8x1xf32> to vector<1x8x1xf32>
    %cst_8 = arith.constant dense<0.000000e+00> : vector<1xf32>
    %22 = vector.multi_reduction <add>, %21, %cst_8 [1, 2] : vector<1x8x1xf32> to vector<1xf32>
    %23 = vector.shape_cast %22 : vector<1xf32> to vector<1x1x1xf32>
    %24 = vector.extract %23[0, 0, 0] : f32 from vector<1x1x1xf32>
    %cst_9 = arith.constant 1.250000e-01 : f32
    %25 = arith.mulf %24, %cst_9 : f32
    %c0_10 = arith.constant 0 : index
    %26 = memref.load %arg2[%c0_10] : memref<2xf32, #tpu.memory_space<smem>>
    %cst_11 = arith.constant 0.000000e+00 : f32
    %27 = arith.subf %cst_11, %26 : f32
    %28 = math.exp %27 : f32
    %29 = arith.mulf %28, %25 : f32
    %cst_12 = arith.constant 0.000000e+00 : f32
    %30 = arith.addf %cst_12, %29 : f32
    %31 = arith.addf %30, %26 : f32
    %32 = vector.extract_strided_slice %18 {offsets = [1, 0, 0], sizes = [1, 8, 1], strides = [1, 1, 1]} : vector<2x8x1xf32> to vector<1x8x1xf32>
    %33 = vector.shape_cast %32 : vector<1x8x1xf32> to vector<8x1xf32>
    %34 = vector.shape_cast %33 : vector<8x1xf32> to vector<1x8x1xf32>
    %cst_13 = arith.constant dense<0.000000e+00> : vector<1xf32>
    %35 = vector.multi_reduction <add>, %34, %cst_13 [1, 2] : vector<1x8x1xf32> to vector<1xf32>
    %36 = vector.shape_cast %35 : vector<1xf32> to vector<1x1x1xf32>
    %37 = vector.extract %36[0, 0, 0] : f32 from vector<1x1x1xf32>
    %cst_14 = arith.constant 1.250000e-01 : f32
    %38 = arith.mulf %37, %cst_14 : f32
    %c1 = arith.constant 1 : index
    %39 = memref.load %arg2[%c1] : memref<2xf32, #tpu.memory_space<smem>>
    %cst_15 = arith.constant 0.000000e+00 : f32
    %40 = arith.subf %cst_15, %39 : f32
    %41 = math.exp %40 : f32
    %42 = arith.mulf %41, %38 : f32
    %43 = arith.addf %31, %42 : f32
    %44 = arith.addf %43, %39 : f32
    %c0_16 = arith.constant 0 : index
    %c0_17 = arith.constant 0 : index
    %45 = memref.load %arg3[%c0_16, %c0_17] : memref<1x1xf32, #tpu.memory_space<smem>>
    memref.store %44, %arg3[%c0_16, %c0_17] : memref<1x1xf32, #tpu.memory_space<smem>>
    return
  }
}

</mosaic_0001>

<bundles_post_ra>
// kernel: tpu_custom_call.1
= control target key start
LH: loop header
LB: loop body
LE: loop exit
PB: predicated region body
PF: predicated region fallthrough
CT: control target
= control target key end

     0   :  { %8 = vsyncpa [#allocation4], 0  ;;  %s250_s0 = inlined_call_operand.vmem [shape: f32[2,8,32], index: 0, kind: input, shape index: {}]   ;;  %s251_s1 = inlined_call_operand.vmem [shape: s32[2,8,1], index: 1, kind: input, shape index: {}]   ;;  %s252_s2 = inlined_call_operand.vmem [shape: f32[2], index: 2, kind: input, shape index: {}]   ;;  %s253_s3 = inlined_call_operand.hbm [shape: f32[1,1], index: 3, kind: output, shape index: {}]  }
   0x1   :  { %9 = vsyncpa [#allocation3], 0  ;;  %s20_s14 = sshll.u32 %s252_s2, 4  ;;  %s21_s14 = int_to_ptr.vmem [resolvable:$true] %s20_s14 }
   0x2   :  { %s160_s15 = scalar_lea.vmem %s21_s14, 16  ;;  %p165_p1 = scmp.lt.s32.totalorder %s21_s14, %s21_s14 }
   0x3   :  { %p161_p0 = scmp.ne.s32.totalorder %s21_s14, %s160_s15  ;;  %p166_p2 = scmp.lt.s32.totalorder %s160_s15, %s160_s15 }
   0x5   :  { %p167_p3 = por %p166_p2, %p165_p1 }
   0x7   :  { %p168_p4 = pnand %p167_p3, %p161_p0 }
   0x9   :  { %171 = shalt.err (!%p168_p4)
}
   0xa   :  { %s186_s16 = smov [#allocation2]  }
   0xb   :  { %23 = dma.vmem_to_smem %s21_s14, 16, %s186_s16, [#allocation4]  }
   0xc   :  { %182 = dma.done.wait [#allocation4], 16  }
   0xd   :  { %183 = vsyncadd [#allocation4], 4294967280 }
   0xe   :  { %27 = sfence }
   0xf   :  { %v28_v0 = vld [vmem:[%s250_s0] sm:$0xff]  ;;  %vm44_vm0 = vcmask 261120   ;;  %v29_v1 = vld [vmem:[%s250_s0 + $0x8] sm:$0xff]  ;;  %v187_v4 = vmov 0   ;;  %v32_v11 = vlaneseq  ;;  %vm77_vm3 = vcmask 7168   ;;  %s230_s0 = sld [smem:[#allocation2]] }
  0x10   :  { %v30_v2 = vld [vmem:[%s251_s1] sm:$0xff]  ;;  %v51_v3 = vsel %vm44_vm0, %v28_v0, -inf  ;;  %146 = vset.pattern.permute.xlu1 %v187_v4  ;;  %147 = vset.pattern.permute.xlu0 %v187_v4  ;;  %v54_v5 = vsel %vm44_vm0, %v29_v1, -inf  ;;  %v31_v6 = vld [vmem:[%s251_s1 + $0x8] sm:$0xff]  ;;  %s232_s1 = sld [smem:[#allocation2 + $0x1]]  ;;  %s172_s12 = scalar_lea.hbm %s253_s3, 16 }
  0x11   :  { %52 = vmax.xlane.f32.xlu0 %v51_v3  ;;  %35 = vperm.xlu1 %146, %v30_v2   ;;  %v33_v15 = vand.u32 127, %v32_v11  ;;  %p173_p5 = scmp.ne.s32.totalorder %s253_s3, %s172_s12  ;;  %p176_p6 = scmp.lt.u32.totalorder %s172_s12, %s253_s3 }
  0x13   :  { %p178_p7 = pnand %p176_p6, %p173_p5 }
  0x15   :  { %55 = vmax.xlane.f32.xlu0 %v54_v5  ;;  %38 = vperm.xlu1 %146, %v31_v6   ;;  %s90_s24 = ssub.f32 0.0, %s230_s0 }
  0x16   :  { %s110_s25 = ssub.f32 0.0, %s232_s1 }
  0x17   :  { %v91_v39 = vstv %s90_s24 }
  0x18   :  { %v92_v40 = vmul.f32 1.442695, %v91_v39  ;;  %v111_v41 = vstv %s110_s25 }
  0x19   :  { %v112_v44 = vmul.f32 1.442695, %v111_v41 }
  0x90   :  { %v36_v14 = vpop.permute.xlu1 %35 }
  0x91   :  { %vm40_vm1 = vcmp.eq.s32.totalorder %v33_v15, %v36_v14 }
  0x92   :  { %v42_v18 = vsel %vm40_vm1, %v28_v0, 0.0 }
  0x93   :  { %v45_v20 = vsel %vm44_vm0, %v42_v18, 0.0 }
  0x94   :  { %v39_v16 = vpop.permute.xlu1 %38 }
  0x95   :  { %vm41_vm2 = vcmp.eq.s32.totalorder %v33_v15, %v39_v16 }
  0x96   :  { %v43_v22 = vsel %vm41_vm2, %v29_v1, 0.0 }
  0x97   :  { %v48_v24 = vsel %vm44_vm0, %v43_v22, 0.0 }
  0x9e   :  { %v53_v7 = vpop.xlane.xlu0 %52 }
  0x9f   :  { %v57_v8 = vsub.f32 %v28_v0, %v53_v7 }
  0xa1   :  { %v59_v9 = vmul.f32 1.442695, %v57_v8 }
  0xa2   :  { %v56_v10 = vpop.xlane.xlu0 %55 }
  0xa3   :  { %148 = vpow2.f32 %v59_v9  ;;  %v58_v12 = vsub.f32 %v29_v1, %v56_v10 }
  0xa5   :  { %v61_v13 = vmul.f32 1.442695, %v58_v12 }
  0xa7   :  { %150 = vpow2.f32 %v61_v13 }
  0xad   :  { %v149_v17 = vpop.eup %148 }
  0xae   :  { %v63_v19 = vsel %vm44_vm0, %v149_v17, 0.0 }
  0xaf   :  { %64 = vadd.xlane.f32.xlu0 %v63_v19 }
  0xb1   :  { %v151_v21 = vpop.eup %150 }
  0xb2   :  { %v66_v23 = vsel %vm44_vm0, %v151_v21, 0.0 }
  0xb3   :  { %67 = vadd.xlane.f32.xlu1 %v66_v23  ;;  %46 = vadd.xlane.f32.xlu0 %v45_v20 }
  0xb7   :  { %49 = vadd.xlane.f32.xlu0 %v48_v24 }
 0x13c   :  { %v65_v25 = vpop.xlane.xlu0 %64 }
 0x13d   :  { %152 = vlog2.f32 %v65_v25 }
 0x140   :  { %v68_v26 = vpop.xlane.xlu1 %67  ;;  %v47_v29 = vpop.xlane.xlu0 %46 }
 0x141   :  { %154 = vlog2.f32 %v68_v26 }
 0x142   :  { %156 = vpow2.f32 %v92_v40 }
 0x143   :  { %158 = vpow2.f32 %v112_v44 }
 0x144   :  { %v50_v36 = vpop.xlane.xlu0 %49 }
 0x147   :  { %v153_v27 = vpop.eup %152 }
 0x148   :  { %v70_v28 = vmul.f32 0.6931472, %v153_v27 }
 0x14a   :  { %v73_v30 = vadd.f32 %v70_v28, %v53_v7 }
 0x14b   :  { %v155_v31 = vpop.eup %154 }
 0x14c   :  { %v72_v32 = vmul.f32 0.6931472, %v155_v31  ;;  %v75_v33 = vsub.f32 %v73_v30, %v47_v29  ;;  %v157_v53 = vpop.eup %156 }
 0x14d   :  { %v159_v57 = vpop.eup %158 }
 0x14e   :  { %v74_v34 = vadd.f32 %v72_v32, %v56_v10  ;;  %v78_v35 = vsel %vm77_vm3, %v75_v33, 0.0 }
 0x14f   :  { %79 = vadd.xlane.f32.xlu0 %v78_v35 }
 0x150   :  { %v76_v37 = vsub.f32 %v74_v34, %v50_v36 }
 0x152   :  { %v98_v38 = vsel %vm77_vm3, %v76_v37, 0.0 }
 0x153   :  { %99 = vadd.xlane.f32.xlu0 %v98_v38 }
 0x1dc   :  { %v80_v42 = vpop.xlane.xlu0 %79 }
 0x1dd   :  { %v81_v43 = vrot.slane %v80_v42, 4 }
 0x1df   :  { %v82_v45 = vadd.f32 %v81_v43, %v80_v42 }
 0x1e0   :  { %v100_v46 = vpop.xlane.xlu0 %99 }
 0x1e1   :  { %v83_v47 = vrot.slane %v82_v45, 2  ;;  %v101_v48 = vrot.slane %v100_v46, 4 }
 0x1e3   :  { %v102_v49 = vadd.f32 %v101_v48, %v100_v46  ;;  %v84_v50 = vadd.f32 %v83_v47, %v82_v45 }
 0x1e5   :  { %v103_v51 = vrot.slane %v102_v49, 2  ;;  %v85_v52 = vrot.slane %v84_v50, 1 }
 0x1e7   :  { %v104_v54 = vadd.f32 %v103_v51, %v102_v49  ;;  %v86_v55 = vadd.f32 %v85_v52, %v84_v50 }
 0x1e9   :  { %135 = vpush %v86_v55  ;;  %v105_v56 = vrot.slane %v104_v54, 1 }
 0x1ea   :  { %137 = vpush %v157_v53 }
 0x1eb   :  { %v106_v58 = vadd.f32 %v105_v56, %v104_v54 }
 0x1ed   :  { %139 = vpush %v106_v58 }
 0x1ee   :  { %141 = vpush %v159_v57 }
 0x21a   :  { %s136_s26 = spop %135 }
 0x21b   :  { %s88_s27 = smul.f32 0.125, %s136_s26  ;;  %s138_s28 = spop %137 }
 0x21d   :  { %s95_s29 = smul.f32 %s138_s28, %s88_s27 }
 0x21e   :  { %s140_s30 = spop %139 }
 0x21f   :  { %s108_s4 = smul.f32 0.125, %s140_s30  ;;  %s142_s5 = spop %141 }
 0x220   :  { %s97_s6 = sadd.f32 %s95_s29, %s230_s0 }
 0x221   :  { %s115_s7 = smul.f32 %s142_s5, %s108_s4 }
 0x223   :  { %s116_s8 = sadd.f32 %s115_s7, %s97_s6 }
 0x225   :  { %s117_s9 = sadd.f32 %s232_s1, %s116_s8 }
 0x227   :  { %119 = sst [smem:[#allocation5]] %s117_s9 }
 0x228   :  { %181 = shalt.err (!%p178_p7)
}
 0x229   :  { %s188_s17 = smov [#allocation5]  }
 0x22a   :  { %127 = dma.smem_to_hbm %s188_s17, 16, %s253_s3, [#allocation3]  }
 0x22b   :  { %184 = dma.done.wait [#allocation3], 16  }
 0x22c   :  { %185 = vsyncadd [#allocation3], 4294967280 }
 0x22d   :  { %131 = sfence }
 0x22e   :  { %132 = vsyncpa [#allocation3], 1 }
 0x22f   :  { %133 = vsyncpa [#allocation4], 1 }

</bundles_post_ra>
